<compile_context>
chip_gen: v5e
topology: v5e:2x2
jax: 0.10.0
libtpu: 0.0.40
codegen_flags: <defaults>
</compile_context>

<pallas_src>
import functools

import jax
import jax.numpy as jnp
from jax.experimental import pallas as pl
from jax.experimental.pallas import tpu as pltpu

FEAT = 784          # 28*28
DIMS = [(FEAT, 256), (256, 128), (128, 64), (64, 10)]
NUM_CLASSES = 10


def _round_up(n, m):
    return ((n + m - 1) // m) * m


def _mlp_kernel(x_ref, w1_ref, b1_ref, w2_ref, b2_ref,
                w3_ref, b3_ref, w4_ref, b4_ref, o_ref):
    # fc1 + ReLU: bf16 MXU inputs (cast in-kernel, no HBM copy), f32 accumulation.
    # Dropout = identity in eval mode.
    x = x_ref[...].astype(jnp.bfloat16)
    h = jnp.dot(x, w1_ref[...], preferred_element_type=jnp.float32)
    h = jnp.maximum(h + b1_ref[...], 0.0)
    # fc2..fc4 in f32: <15% of FLOPs and the kernel is HBM-bound, so accuracy is free.
    h = jnp.maximum(
        jnp.dot(h, w2_ref[...], preferred_element_type=jnp.float32) + b2_ref[...], 0.0)
    h = jnp.maximum(
        jnp.dot(h, w3_ref[...], preferred_element_type=jnp.float32) + b3_ref[...], 0.0)
    z = jnp.dot(h, w4_ref[...], preferred_element_type=jnp.float32) + b4_ref[...]
    # Numerically stable log_softmax over the class dim (f32).
    m = jnp.max(z, axis=-1, keepdims=True)
    lse = m + jnp.log(jnp.sum(jnp.exp(z - m), axis=-1, keepdims=True))
    o_ref[...] = (z - lse).astype(o_ref.dtype)


def _choose_tiling(B, tile_b):
    """Return (tb, Bp, nsteps).

    * B <= 8: one block equal to the full array (no padding; block==array dims is legal).
    * Otherwise: >= 2 grid steps (so v7x's 2 TensorCores both get work) with tile rows a
      multiple of 8, sized ~ceil(B / nsteps) to keep dead-row padding minimal.
    """
    if B <= 8:
        return B, B, 1
    Bp8 = _round_up(B, 8)
    nsteps = max(2, pl.cdiv(Bp8, tile_b))
    tb = _round_up(pl.cdiv(Bp8, nsteps), 8)
    nsteps = pl.cdiv(Bp8, tb)
    return tb, tb * nsteps, nsteps


@functools.partial(jax.jit, static_argnames=("tile_b",))
def classifier_forward(x_nchw, params, tile_b=512):
    """x_nchw: (B, 1, 28, 28) float32. Returns (B, 10) float32 log-probabilities."""
    B = x_nchw.shape[0]
    w1, b1, w2, b2, w3, b3, w4, b4 = params

    # Flatten like torch's x.view(B, -1); stays f32 in HBM (no extra materialized copy).
    x = x_nchw.reshape(B, -1)

    tb, Bp, nsteps = _choose_tiling(B, tile_b)
    if Bp != B:
        # Only for ragged batches: zero-pad dead rows (sliced off after the call).
        x = jnp.pad(x, ((0, Bp - B), (0, 0)))

    # fc1 weight in bf16 for the MXU (tiny: ~0.4 MiB); fc2-4 weights stay f32.
    w1b = w1.astype(jnp.bfloat16)

    # Weights/biases: full-array blocks, constant index map -> DMA'd once, VMEM-resident.
    def const_spec(shape):
        return pl.BlockSpec(shape, lambda i: (0, 0))

    flops = 2 * Bp * sum(fi * fo for fi, fo in DIMS)
    weight_bytes = int(w1b.size) * 2 + sum(
        int(a.size) * 4 for a in (b1, w2, b2, w3, b3, w4, b4))
    bytes_accessed = Bp * FEAT * 4 + weight_bytes + Bp * NUM_CLASSES * 4
    cost = pl.CostEstimate(flops=flops,
                           transcendentals=Bp * (NUM_CLASSES + 1),
                           bytes_accessed=bytes_accessed)

    out = pl.pallas_call(
        _mlp_kernel,
        out_shape=jax.ShapeDtypeStruct((Bp, NUM_CLASSES), jnp.float32),
        grid=(nsteps,),
        in_specs=[
            pl.BlockSpec((tb, FEAT), lambda i: (i, 0)),   # x tile (auto double-buffered)
            const_spec(w1b.shape), const_spec(b1.shape),
            const_spec(w2.shape), const_spec(b2.shape),
            const_spec(w3.shape), const_spec(b3.shape),
            const_spec(w4.shape), const_spec(b4.shape),
        ],
        # 10-wide output kept as-is: output bytes are tiny vs x; lane-dense padding to 128
        # only if profiling shows masked stores hurting (most relevant on v5e).
        out_specs=pl.BlockSpec((tb, NUM_CLASSES), lambda i: (i, 0)),
        compiler_params=pltpu.CompilerParams(
            dimension_semantics=("parallel",),          # batch sharded across v7x's 2 TCs
            vmem_limit_bytes=32 * 1024 * 1024,          # actual use < 8 MiB at tb=512
        ),
        cost_estimate=cost,
    )(x, w1b, b1, w2, b2, w3, b3, w4, b4)

    return out[:B] if Bp != B else out


def init_params(key):
    """Deterministic init matching nn.Linear shapes (stored transposed: (in, out)), f32."""
    params = []
    for i, (fan_in, fan_out) in enumerate(DIMS):
        kw, kb = jax.random.split(jax.random.fold_in(key, i))
        bound = 1.0 / jnp.sqrt(fan_in)
        w = jax.random.uniform(kw, (fan_in, fan_out), jnp.float32, -bound, bound)
        b = jax.random.uniform(kb, (1, fan_out), jnp.float32, -bound, bound)
        params.extend([w, b])
    return tuple(params)


def _reference_forward(x_nchw, params):
    """Pure-JAX f32 reference (eval-mode dropout = identity)."""
    w1, b1, w2, b2, w3, b3, w4, b4 = params
    x = x_nchw.reshape(x_nchw.shape[0], -1)
    h = jnp.maximum(x @ w1 + b1, 0.0)
    h = jnp.maximum(h @ w2 + b2, 0.0)
    h = jnp.maximum(h @ w3 + b3, 0.0)
    z = h @ w4 + b4
    return jax.nn.log_softmax(z, axis=1)


if __name__ == "__main__":
    key = jax.random.PRNGKey(0)
    k_x, k_p = jax.random.split(key)

    B = 8
    x = jax.random.normal(k_x, (B, 1, 28, 28), jnp.float32)  # NCHW like torch
    params = init_params(k_p)

    out = classifier_forward(x, params)
    out = jax.block_until_ready(out)

    ref = _reference_forward(x, params)
    assert out.shape == (B, 10)
    # Only fc1 uses bf16 inputs (f32 accumulation); the rest is f32 -> tight-ish tolerance.
    assert jnp.allclose(out, ref, atol=5e-2, rtol=5e-2), "mismatch vs reference"
    # log-probabilities of each row should sum to 1 after exp.
    assert jnp.allclose(jnp.sum(jnp.exp(out), axis=1), 1.0, atol=1e-3)

    print("KERNEL_OK")
</pallas_src>

<mosaic_0001>
module attributes {stable_mosaic.version = 11 : i64} {
  func.func @_mlp_kernel(%arg0: i32, %arg1: memref<8x784xf32, #tpu.memory_space<vmem>>, %arg2: memref<784x256xbf16, #tpu.memory_space<vmem>>, %arg3: memref<1x256xf32, #tpu.memory_space<vmem>>, %arg4: memref<256x128xf32, #tpu.memory_space<vmem>>, %arg5: memref<1x128xf32, #tpu.memory_space<vmem>>, %arg6: memref<128x64xf32, #tpu.memory_space<vmem>>, %arg7: memref<1x64xf32, #tpu.memory_space<vmem>>, %arg8: memref<64x10xf32, #tpu.memory_space<vmem>>, %arg9: memref<1x10xf32, #tpu.memory_space<vmem>>, %arg10: memref<8x10xf32, #tpu.memory_space<vmem>>) attributes {dimension_semantics = [#tpu.dimension_semantics<parallel>], iteration_bounds = array<i64: 1>, scalar_prefetch = 0 : i64, scratch_operands = 0 : i64, tpu.core_type = #tpu.core_type<tc>, window_params = [{transform_indices = @transform_0, window_bounds = array<i64: 8, 784>}, {pipeline_mode = #tpu.pipeline_mode<synchronous>, transform_indices = @transform_1, window_bounds = array<i64: 784, 256>}, {pipeline_mode = #tpu.pipeline_mode<synchronous>, transform_indices = @transform_2, window_bounds = array<i64: 1, 256>}, {pipeline_mode = #tpu.pipeline_mode<synchronous>, transform_indices = @transform_3, window_bounds = array<i64: 256, 128>}, {pipeline_mode = #tpu.pipeline_mode<synchronous>, transform_indices = @transform_4, window_bounds = array<i64: 1, 128>}, {pipeline_mode = #tpu.pipeline_mode<synchronous>, transform_indices = @transform_5, window_bounds = array<i64: 128, 64>}, {pipeline_mode = #tpu.pipeline_mode<synchronous>, transform_indices = @transform_6, window_bounds = array<i64: 1, 64>}, {pipeline_mode = #tpu.pipeline_mode<synchronous>, transform_indices = @transform_7, window_bounds = array<i64: 64, 10>}, {pipeline_mode = #tpu.pipeline_mode<synchronous>, transform_indices = @transform_8, window_bounds = array<i64: 1, 10>}, {transform_indices = @transform_9, window_bounds = array<i64: 8, 10>}]} {
    %c0 = arith.constant 0 : index
    %c0_0 = arith.constant 0 : index
    %0 = vector.load %arg1[%c0, %c0_0] : memref<8x784xf32, #tpu.memory_space<vmem>>, vector<8x784xf32>
    %1 = arith.truncf %0 : vector<8x784xf32> to vector<8x784xbf16>
    %c0_1 = arith.constant 0 : index
    %c0_2 = arith.constant 0 : index
    %2 = vector.load %arg2[%c0_1, %c0_2] : memref<784x256xbf16, #tpu.memory_space<vmem>>, vector<784x256xbf16>
    %cst = arith.constant dense<0.000000e+00> : vector<8x256xf32>
    %3 = tpu.matmul %1, %2, %cst {dimension_numbers = #tpu.dot_dimension_numbers<[1], [0], [0], [1], [0, 0, 1, 1], [], []>} : vector<8x784xbf16>, vector<784x256xbf16>, vector<8x256xf32> -> vector<8x256xf32>
    %c0_3 = arith.constant 0 : index
    %c0_4 = arith.constant 0 : index
    %4 = vector.load %arg3[%c0_3, %c0_4] : memref<1x256xf32, #tpu.memory_space<vmem>>, vector<1x256xf32>
    %5 = vector.broadcast %4 : vector<1x256xf32> to vector<8x256xf32>
    %6 = arith.addf %3, %5 : vector<8x256xf32>
    %cst_5 = arith.constant 0.000000e+00 : f32
    %7 = vector.broadcast %cst_5 : f32 to vector<8x256xf32>
    %8 = arith.maximumf %6, %7 : vector<8x256xf32>
    %c0_6 = arith.constant 0 : index
    %c0_7 = arith.constant 0 : index
    %9 = vector.load %arg4[%c0_6, %c0_7] : memref<256x128xf32, #tpu.memory_space<vmem>>, vector<256x128xf32>
    %cst_8 = arith.constant dense<0.000000e+00> : vector<8x128xf32>
    %10 = tpu.matmul %8, %9, %cst_8 {dimension_numbers = #tpu.dot_dimension_numbers<[1], [0], [0], [1], [0, 0, 1, 1], [], []>} : vector<8x256xf32>, vector<256x128xf32>, vector<8x128xf32> -> vector<8x128xf32>
    %c0_9 = arith.constant 0 : index
    %c0_10 = arith.constant 0 : index
    %11 = vector.load %arg5[%c0_9, %c0_10] : memref<1x128xf32, #tpu.memory_space<vmem>>, vector<1x128xf32>
    %12 = vector.broadcast %11 : vector<1x128xf32> to vector<8x128xf32>
    %13 = arith.addf %10, %12 : vector<8x128xf32>
    %cst_11 = arith.constant 0.000000e+00 : f32
    %14 = vector.broadcast %cst_11 : f32 to vector<8x128xf32>
    %15 = arith.maximumf %13, %14 : vector<8x128xf32>
    %c0_12 = arith.constant 0 : index
    %c0_13 = arith.constant 0 : index
    %16 = vector.load %arg6[%c0_12, %c0_13] : memref<128x64xf32, #tpu.memory_space<vmem>>, vector<128x64xf32>
    %cst_14 = arith.constant dense<0.000000e+00> : vector<8x64xf32>
    %17 = tpu.matmul %15, %16, %cst_14 {dimension_numbers = #tpu.dot_dimension_numbers<[1], [0], [0], [1], [0, 0, 1, 1], [], []>} : vector<8x128xf32>, vector<128x64xf32>, vector<8x64xf32> -> vector<8x64xf32>
    %c0_15 = arith.constant 0 : index
    %c0_16 = arith.constant 0 : index
    %18 = vector.load %arg7[%c0_15, %c0_16] : memref<1x64xf32, #tpu.memory_space<vmem>>, vector<1x64xf32>
    %19 = vector.broadcast %18 : vector<1x64xf32> to vector<8x64xf32>
    %20 = arith.addf %17, %19 : vector<8x64xf32>
    %cst_17 = arith.constant 0.000000e+00 : f32
    %21 = vector.broadcast %cst_17 : f32 to vector<8x64xf32>
    %22 = arith.maximumf %20, %21 : vector<8x64xf32>
    %c0_18 = arith.constant 0 : index
    %c0_19 = arith.constant 0 : index
    %23 = vector.load %arg8[%c0_18, %c0_19] : memref<64x10xf32, #tpu.memory_space<vmem>>, vector<64x10xf32>
    %cst_20 = arith.constant dense<0.000000e+00> : vector<8x10xf32>
    %24 = tpu.matmul %22, %23, %cst_20 {dimension_numbers = #tpu.dot_dimension_numbers<[1], [0], [0], [1], [0, 0, 1, 1], [], []>} : vector<8x64xf32>, vector<64x10xf32>, vector<8x10xf32> -> vector<8x10xf32>
    %c0_21 = arith.constant 0 : index
    %c0_22 = arith.constant 0 : index
    %25 = vector.load %arg9[%c0_21, %c0_22] : memref<1x10xf32, #tpu.memory_space<vmem>>, vector<1x10xf32>
    %26 = vector.broadcast %25 : vector<1x10xf32> to vector<8x10xf32>
    %27 = arith.addf %24, %26 : vector<8x10xf32>
    %cst_23 = arith.constant dense<0xFF800000> : vector<8xf32>
    %28 = vector.multi_reduction <maximumf>, %27, %cst_23 [1] : vector<8x10xf32> to vector<8xf32>
    %29 = vector.shape_cast %28 : vector<8xf32> to vector<8x1xf32>
    %30 = vector.broadcast %29 : vector<8x1xf32> to vector<8x10xf32>
    %31 = arith.subf %27, %30 : vector<8x10xf32>
    %32 = math.exp %31 : vector<8x10xf32>
    %cst_24 = arith.constant dense<0.000000e+00> : vector<8xf32>
    %33 = vector.multi_reduction <add>, %32, %cst_24 [1] : vector<8x10xf32> to vector<8xf32>
    %34 = vector.shape_cast %33 : vector<8xf32> to vector<8x1xf32>
    %35 = math.log %34 : vector<8x1xf32>
    %36 = arith.addf %29, %35 : vector<8x1xf32>
    %37 = vector.broadcast %36 : vector<8x1xf32> to vector<8x10xf32>
    %38 = arith.subf %27, %37 : vector<8x10xf32>
    %c0_25 = arith.constant 0 : index
    %c0_26 = arith.constant 0 : index
    %39 = vector.load %arg10[%c0_25, %c0_26] : memref<8x10xf32, #tpu.memory_space<vmem>>, vector<8x10xf32>
    tpu.vector_store %arg10[%c0_25, %c0_26], %38 {strides = array<i32>} : memref<8x10xf32, #tpu.memory_space<vmem>>, vector<8x10xf32>,
    return
  }
  func.func @transform_0(%arg0: i32) -> (i32, i32) {
    %c0_i32 = arith.constant 0 : i32
    %c0_i32_0 = arith.constant 0 : i32
    return %arg0, %c0_i32 : i32, i32
  }
  func.func @transform_1(%arg0: i32) -> (i32, i32) {
    %c0_i32 = arith.constant 0 : i32
    %c0_i32_0 = arith.constant 0 : i32
    %c0_i32_1 = arith.constant 0 : i32
    return %c0_i32, %c0_i32_0 : i32, i32
  }
  func.func @transform_2(%arg0: i32) -> (i32, i32) {
    %c0_i32 = arith.constant 0 : i32
    %c0_i32_0 = arith.constant 0 : i32
    %c0_i32_1 = arith.constant 0 : i32
    return %c0_i32, %c0_i32_0 : i32, i32
  }
  func.func @transform_3(%arg0: i32) -> (i32, i32) {
    %c0_i32 = arith.constant 0 : i32
    %c0_i32_0 = arith.constant 0 : i32
    %c0_i32_1 = arith.constant 0 : i32
    return %c0_i32, %c0_i32_0 : i32, i32
  }
  func.func @transform_4(%arg0: i32) -> (i32, i32) {
    %c0_i32 = arith.constant 0 : i32
    %c0_i32_0 = arith.constant 0 : i32
    %c0_i32_1 = arith.constant 0 : i32
    return %c0_i32, %c0_i32_0 : i32, i32
  }
  func.func @transform_5(%arg0: i32) -> (i32, i32) {
    %c0_i32 = arith.constant 0 : i32
    %c0_i32_0 = arith.constant 0 : i32
    %c0_i32_1 = arith.constant 0 : i32
    return %c0_i32, %c0_i32_0 : i32, i32
  }
  func.func @transform_6(%arg0: i32) -> (i32, i32) {
    %c0_i32 = arith.constant 0 : i32
    %c0_i32_0 = arith.constant 0 : i32
    %c0_i32_1 = arith.constant 0 : i32
    return %c0_i32, %c0_i32_0 : i32, i32
  }
  func.func @transform_7(%arg0: i32) -> (i32, i32) {
    %c0_i32 = arith.constant 0 : i32
    %c0_i32_0 = arith.constant 0 : i32
    %c0_i32_1 = arith.constant 0 : i32
    return %c0_i32, %c0_i32_0 : i32, i32
  }
  func.func @transform_8(%arg0: i32) -> (i32, i32) {
    %c0_i32 = arith.constant 0 : i32
    %c0_i32_0 = arith.constant 0 : i32
    %c0_i32_1 = arith.constant 0 : i32
    return %c0_i32, %c0_i32_0 : i32, i32
  }
  func.func @transform_9(%arg0: i32) -> (i32, i32) {
    %c0_i32 = arith.constant 0 : i32
    %c0_i32_0 = arith.constant 0 : i32
    return %arg0, %c0_i32 : i32, i32
  }
}

</mosaic_0001>

<bundles_post_ra>
// kernel: classifier_forward.1
= control target key start
LH: loop header
LB: loop body
LE: loop exit
PB: predicated region body
PF: predicated region fallthrough
CT: control target
= control target key end

     0   :  { %vm642_vm0 = vcmask 130048   ;;  %s2418_s0 = inlined_call_operand.vmem [shape: f32[8,784], index: 0, kind: input, shape index: {}]   ;;  %s2419_s1 = inlined_call_operand.vmem [shape: bf16[784,256], index: 1, kind: input, shape index: {}]   ;;  %s2420_s2 = inlined_call_operand.vmem [shape: f32[1,256], index: 2, kind: input, shape index: {}]   ;;  %s2421_s3 = inlined_call_operand.vmem [shape: f32[256,128], index: 3, kind: input, shape index: {}]   ;;  %s2422_s4 = inlined_call_operand.vmem [shape: f32[1,128], index: 4, kind: input, shape index: {}]   ;;  %s2423_s5 = inlined_call_operand.vmem [shape: f32[128,64], index: 5, kind: input, shape index: {}]   ;;  %s2424_s6 = inlined_call_operand.vmem [shape: f32[1,64], index: 6, kind: input, shape index: {}]   ;;  %s2425_s7 = inlined_call_operand.vmem [shape: f32[64,10], index: 7, kind: input, shape index: {}]   ;;  %s2426_s8 = inlined_call_operand.vmem [shape: f32[1,10], index: 8, kind: input, shape index: {}]   ;;  %s2427_s9 = inlined_call_operand.hbm [shape: f32[8,10], index: 9, kind: output, shape index: {}]  }
   0x1   :  { %v1073_v0 = vld [vmem:[%s2419_s1 + $0x70] sm:$0xf]  ;;  %v1425_v1 = vld [vmem:[%s2419_s1 + $0x74] sm:$0xf0]  ;;  %v1065_v11 = vld [vmem:[%s2419_s1 + $0x60] sm:$0xf] }
   0x2   :  { %v1201_v2 = vld [vmem:[%s2419_s1 + $0x170] sm:$0xf]  ;;  %v1074_v3 = vor.u32 %v1425_v1, %v1073_v0  ;;  %v1457_v4 = vld [vmem:[%s2419_s1 + $0x174] sm:$0xf0]  ;;  %v1423_v13 = vld [vmem:[%s2419_s1 + $0x64] sm:$0xf0] }
   0x3   :  { %v1265_v5 = vld [vmem:[%s2419_s1 + $0x1f0] sm:$0xf]  ;;  %v1473_v6 = vld [vmem:[%s2419_s1 + $0x1f4] sm:$0xf0]  ;;  %v1202_v7 = vor.u32 %v1457_v4, %v1201_v2  ;;  %v1193_v14 = vld [vmem:[%s2419_s1 + $0x160] sm:$0xf]  ;;  %v1066_v16 = vor.u32 %v1423_v13, %v1065_v11 }
   0x4   :  { %v1266_v8 = vor.u32 %v1473_v6, %v1265_v5  ;;  %v1137_v9 = vld [vmem:[%s2419_s1 + $0xf0] sm:$0xf]  ;;  %v1441_v10 = vld [vmem:[%s2419_s1 + $0xf4] sm:$0xf0]  ;;  %646 = vmatpush.bf16.msra.mxu0 %v1074_v3  ;;  %v1455_v15 = vld [vmem:[%s2419_s1 + $0x164] sm:$0xf0] }
   0x5   :  { %v1138_v12 = vor.u32 %v1441_v10, %v1137_v9  ;;  %672 = vmatpush.bf16.msra.mxu2 %v1202_v7  ;;  %v1194_v17 = vor.u32 %v1455_v15, %v1193_v14  ;;  %v1257_v18 = vld [vmem:[%s2419_s1 + $0x1e0] sm:$0xf]  ;;  %v1471_v19 = vld [vmem:[%s2419_s1 + $0x1e4] sm:$0xf0]  ;;  %v1057_v23 = vld [vmem:[%s2419_s1 + $0x50] sm:$0xf] }
   0x6   :  { %685 = vmatpush.bf16.msra.mxu3 %v1266_v8  ;;  %v1129_v20 = vld [vmem:[%s2419_s1 + $0xe0] sm:$0xf]  ;;  %v1258_v21 = vor.u32 %v1471_v19, %v1257_v18  ;;  %v1439_v22 = vld [vmem:[%s2419_s1 + $0xe4] sm:$0xf0]  ;;  %v1421_v24 = vld [vmem:[%s2419_s1 + $0x54] sm:$0xf0] }
   0x7   :  { %659 = vmatpush.bf16.msra.mxu1 %v1138_v12  ;;  %v1130_v25 = vor.u32 %v1439_v22, %v1129_v20  ;;  %v1185_v26 = vld [vmem:[%s2419_s1 + $0x150] sm:$0xf]  ;;  %v1453_v27 = vld [vmem:[%s2419_s1 + $0x154] sm:$0xf0]  ;;  %v1058_v29 = vor.u32 %v1421_v24, %v1057_v23  ;;  %v1049_v35 = vld [vmem:[%s2419_s1 + $0x40] sm:$0xf] }
   0x8   :  { %v1249_v28 = vld [vmem:[%s2419_s1 + $0x1d0] sm:$0xf]  ;;  %647 = vmatpush.bf16.msra.mxu0 %v1066_v16  ;;  %v1469_v30 = vld [vmem:[%s2419_s1 + $0x1d4] sm:$0xf0]  ;;  %v1186_v33 = vor.u32 %v1453_v27, %v1185_v26  ;;  %v1419_v36 = vld [vmem:[%s2419_s1 + $0x44] sm:$0xf0] }
   0x9   :  { %v1121_v31 = vld [vmem:[%s2419_s1 + $0xd0] sm:$0xf]  ;;  %v1437_v32 = vld [vmem:[%s2419_s1 + $0xd4] sm:$0xf0]  ;;  %673 = vmatpush.bf16.msra.mxu2 %v1194_v17  ;;  %v1250_v34 = vor.u32 %v1469_v30, %v1249_v28  ;;  %v1177_v37 = vld [vmem:[%s2419_s1 + $0x140] sm:$0xf]  ;;  %v1050_v44 = vor.u32 %v1419_v36, %v1049_v35 }
   0xa   :  { %686 = vmatpush.bf16.msra.mxu3 %v1258_v21  ;;  %v1122_v38 = vor.u32 %v1437_v32, %v1121_v31  ;;  %v1451_v39 = vld [vmem:[%s2419_s1 + $0x144] sm:$0xf0]  ;;  %v1241_v40 = vld [vmem:[%s2419_s1 + $0x1c0] sm:$0xf]  ;;  %v1041_v47 = vld [vmem:[%s2419_s1 + $0x30] sm:$0xf] }
   0xb   :  { %660 = vmatpush.bf16.msra.mxu1 %v1130_v25  ;;  %v1467_v41 = vld [vmem:[%s2419_s1 + $0x1c4] sm:$0xf0]  ;;  %v1113_v42 = vld [vmem:[%s2419_s1 + $0xc0] sm:$0xf]  ;;  %v1178_v45 = vor.u32 %v1451_v39, %v1177_v37  ;;  %v1417_v48 = vld [vmem:[%s2419_s1 + $0x34] sm:$0xf0] }
   0xc   :  { %v1435_v43 = vld [vmem:[%s2419_s1 + $0xc4] sm:$0xf0]  ;;  %648 = vmatpush.bf16.msra.mxu0 %v1058_v29  ;;  %v1242_v46 = vor.u32 %v1467_v41, %v1241_v40  ;;  %v1169_v49 = vld [vmem:[%s2419_s1 + $0x130] sm:$0xf]  ;;  %v1449_v51 = vld [vmem:[%s2419_s1 + $0x134] sm:$0xf0]  ;;  %v1042_v56 = vor.u32 %v1417_v48, %v1041_v47 }
   0xd   :  { %674 = vmatpush.bf16.msra.mxu2 %v1186_v33  ;;  %v1114_v50 = vor.u32 %v1435_v43, %v1113_v42  ;;  %v1233_v52 = vld [vmem:[%s2419_s1 + $0x1b0] sm:$0xf]  ;;  %v1465_v53 = vld [vmem:[%s2419_s1 + $0x1b4] sm:$0xf0]  ;;  %v1170_v57 = vor.u32 %v1449_v51, %v1169_v49  ;;  %v1033_v59 = vld [vmem:[%s2419_s1 + $0x20] sm:$0xf] }
   0xe   :  { %687 = vmatpush.bf16.msra.mxu3 %v1250_v34  ;;  %v1105_v54 = vld [vmem:[%s2419_s1 + $0xb0] sm:$0xf]  ;;  %v1433_v55 = vld [vmem:[%s2419_s1 + $0xb4] sm:$0xf0]  ;;  %v1234_v58 = vor.u32 %v1465_v53, %v1233_v52  ;;  %v1415_v60 = vld [vmem:[%s2419_s1 + $0x24] sm:$0xf0] }
   0xf   :  { %661 = vmatpush.bf16.msra.mxu1 %v1122_v38  ;;  %v1161_v61 = vld [vmem:[%s2419_s1 + $0x120] sm:$0xf]  ;;  %v1106_v62 = vor.u32 %v1433_v55, %v1105_v54  ;;  %v1447_v63 = vld [vmem:[%s2419_s1 + $0x124] sm:$0xf0]  ;;  %v1034_v4 = vor.u32 %v1415_v60, %v1033_v59  ;;  %v1025_v7 = vld [vmem:[%s2419_s1 + $0x10] sm:$0xf] }
  0x10   :  { %649 = vmatpush.bf16.msra.mxu0 %v1050_v44  ;;  %v1225_v0 = vld [vmem:[%s2419_s1 + $0x1a0] sm:$0xf]  ;;  %v1463_v1 = vld [vmem:[%s2419_s1 + $0x1a4] sm:$0xf0]  ;;  %v1162_v5 = vor.u32 %v1447_v63, %v1161_v61  ;;  %v1413_v8 = vld [vmem:[%s2419_s1 + $0x14] sm:$0xf0] }
  0x11   :  { %675 = vmatpush.bf16.msra.mxu2 %v1178_v45  ;;  %v1097_v2 = vld [vmem:[%s2419_s1 + $0xa0] sm:$0xf]  ;;  %v1431_v3 = vld [vmem:[%s2419_s1 + $0xa4] sm:$0xf0]  ;;  %v1226_v6 = vor.u32 %v1463_v1, %v1225_v0  ;;  %v1153_v9 = vld [vmem:[%s2419_s1 + $0x110] sm:$0xf]  ;;  %v1026_v16 = vor.u32 %v1413_v8, %v1025_v7 }
  0x12   :  { %688 = vmatpush.bf16.msra.mxu3 %v1242_v46  ;;  %v1098_v10 = vor.u32 %v1431_v3, %v1097_v2  ;;  %v1445_v11 = vld [vmem:[%s2419_s1 + $0x114] sm:$0xf0]  ;;  %v1217_v12 = vld [vmem:[%s2419_s1 + $0x190] sm:$0xf]  ;;  %v1017_v17 = vld [vmem:[%s2419_s1] sm:$0xf] }
  0x13   :  { %662 = vmatpush.bf16.msra.mxu1 %v1114_v50  ;;  %v1461_v13 = vld [vmem:[%s2419_s1 + $0x194] sm:$0xf0]  ;;  %v1089_v14 = vld [vmem:[%s2419_s1 + $0x90] sm:$0xf]  ;;  %v1411_v18 = vld [vmem:[%s2419_s1 + $0x4] sm:$0xf0]  ;;  %v1154_v20 = vor.u32 %v1445_v11, %v1153_v9 }
  0x14   :  { %650 = vmatpush.bf16.msra.mxu0 %v1042_v56  ;;  %v1429_v15 = vld [vmem:[%s2419_s1 + $0x94] sm:$0xf0]  ;;  %v1145_v19 = vld [vmem:[%s2419_s1 + $0x100] sm:$0xf]  ;;  %v1218_v21 = vor.u32 %v1461_v13, %v1217_v12  ;;  %v1443_v22 = vld [vmem:[%s2419_s1 + $0x104] sm:$0xf0]  ;;  %v1018_v32 = vor.u32 %v1411_v18, %v1017_v17 }
  0x15   :  { %676 = vmatpush.bf16.msra.mxu2 %v1170_v57  ;;  %v1209_v23 = vld [vmem:[%s2419_s1 + $0x180] sm:$0xf]  ;;  %v1459_v24 = vld [vmem:[%s2419_s1 + $0x184] sm:$0xf0]  ;;  %v1090_v25 = vor.u32 %v1429_v15, %v1089_v14  ;;  %v1329_v26 = vld [vmem:[%s2419_s1 + $0x270] sm:$0xf]  ;;  %v1146_v36 = vor.u32 %v1443_v22, %v1145_v19 }
  0x16   :  { %689 = vmatpush.bf16.msra.mxu3 %v1234_v58  ;;  %v1489_v27 = vld [vmem:[%s2419_s1 + $0x274] sm:$0xf0]  ;;  %v1424_v28 = vld [vmem:[%s2419_s1 + $0x74] sm:$0xf]  ;;  %v1075_v29 = vld [vmem:[%s2419_s1 + $0x78] sm:$0xf0]  ;;  %v1210_v37 = vor.u32 %v1459_v24, %v1209_v23 }
  0x17   :  { %663 = vmatpush.bf16.msra.mxu1 %v1106_v62  ;;  %v1081_v30 = vld [vmem:[%s2419_s1 + $0x80] sm:$0xf]  ;;  %v1427_v31 = vld [vmem:[%s2419_s1 + $0x84] sm:$0xf0]  ;;  %v36_v33 = vld [vmem:[%s2418_s0 + $0x10] sm:$0xff]  ;;  %v1330_v41 = vor.u32 %v1489_v27, %v1329_v26  ;;  %v1078_v42 = vor.u32 %v1424_v28, %v1075_v29 }
  0x18   :  { %651 = vmatpush.bf16.msra.mxu0 %v1034_v4  ;;  %v1401_v34 = vld [vmem:[%s2419_s1 + $0x300] sm:$0xf]  ;;  %v1507_v35 = vld [vmem:[%s2419_s1 + $0x304] sm:$0xf0]  ;;  %v1393_v38 = vld [vmem:[%s2419_s1 + $0x2f0] sm:$0xf]  ;;  %v1082_v46 = vor.u32 %v1427_v31, %v1081_v30  ;;  %v1833_v51 = vpack.c.bf16 %v36_v33, %v36_v33 }
  0x19   :  { %677 = vmatpush.bf16.msra.mxu2 %v1162_v5  ;;  %v1505_v39 = vld [vmem:[%s2419_s1 + $0x2f4] sm:$0xf0]  ;;  %v1440_v40 = vld [vmem:[%s2419_s1 + $0xf4] sm:$0xf]  ;;  %v1139_v43 = vld [vmem:[%s2419_s1 + $0xf8] sm:$0xf0]  ;;  %v1402_v47 = vor.u32 %v1507_v35, %v1401_v34 }
  0x1a   :  { %690 = vmatpush.bf16.msra.mxu3 %v1226_v6  ;;  %v1321_v44 = vld [vmem:[%s2419_s1 + $0x260] sm:$0xf]  ;;  %v1487_v48 = vld [vmem:[%s2419_s1 + $0x264] sm:$0xf0]  ;;  %v1422_v49 = vld [vmem:[%s2419_s1 + $0x64] sm:$0xf]  ;;  %v1394_v52 = vor.u32 %v1505_v39, %v1393_v38  ;;  %v1142_v55 = vor.u32 %v1440_v40, %v1139_v43 }
  0x1b   :  { %664 = vmatpush.bf16.msra.mxu1 %v1098_v10  ;;  %v34_v45 = vld [vmem:[%s2418_s0] sm:$0xff]  ;;  %v1067_v50 = vld [vmem:[%s2419_s1 + $0x68] sm:$0xf0]  ;;  %v37_v53 = vld [vmem:[%s2418_s0 + $0x18] sm:$0xff]  ;;  %v1322_v59 = vor.u32 %v1487_v48, %v1321_v44 }
  0x1c   :  { %652 = vmatpush.bf16.msra.mxu0 %v1026_v16  ;;  %v35_v54 = vld [vmem:[%s2418_s0 + $0x8] sm:$0xff]  ;;  %v1385_v56 = vld [vmem:[%s2419_s1 + $0x2e0] sm:$0xf]  ;;  %v1847_v58 = vpack.c.bf16 %v34_v45, %v34_v45  ;;  %v1070_v60 = vor.u32 %v1422_v49, %v1067_v50  ;;  %v1438_v61 = vld [vmem:[%s2419_s1 + $0xe4] sm:$0xf]  ;;  %v1867_v3 = vpack.c.bf16 %v37_v53, %v37_v53 }
  0x1d   :  { %678 = vmatpush.bf16.msra.mxu2 %v1154_v20  ;;  %v1503_v57 = vld [vmem:[%s2419_s1 + $0x2e4] sm:$0xf0]  ;;  %v1131_v62 = vld [vmem:[%s2419_s1 + $0xe8] sm:$0xf0]  ;;  %v1313_v63 = vld [vmem:[%s2419_s1 + $0x250] sm:$0xf]  ;;  %v1869_v4 = vpack.c.bf16 %v35_v54, %v35_v54 }
  0x1e   :  { %691 = vmatpush.bf16.msra.mxu3 %v1218_v21  ;;  %v1485_v0 = vld [vmem:[%s2419_s1 + $0x254] sm:$0xf0]  ;;  %v1420_v1 = vld [vmem:[%s2419_s1 + $0x54] sm:$0xf]  ;;  %v1059_v2 = vld [vmem:[%s2419_s1 + $0x58] sm:$0xf0]  ;;  %v1386_v5 = vor.u32 %v1503_v57, %v1385_v56  ;;  %v1134_v6 = vor.u32 %v1438_v61, %v1131_v62 }
  0x1f   :  { %665 = vmatpush.bf16.msra.mxu1 %v1090_v25  ;;  %v1377_v7 = vld [vmem:[%s2419_s1 + $0x2d0] sm:$0xf]  ;;  %v1501_v8 = vld [vmem:[%s2419_s1 + $0x2d4] sm:$0xf0]  ;;  %v1314_v9 = vor.u32 %v1485_v0, %v1313_v63  ;;  %v1062_v10 = vor.u32 %v1420_v1, %v1059_v2  ;;  %v1436_v11 = vld [vmem:[%s2419_s1 + $0xd4] sm:$0xf] }
  0x20   :  { %653 = vmatpush.bf16.msra.mxu0 %v1018_v32  ;;  %v1123_v12 = vld [vmem:[%s2419_s1 + $0xd8] sm:$0xf0]  ;;  %v1305_v13 = vld [vmem:[%s2419_s1 + $0x240] sm:$0xf]  ;;  %v1483_v14 = vld [vmem:[%s2419_s1 + $0x244] sm:$0xf0]  ;;  %v1378_v17 = vor.u32 %v1501_v8, %v1377_v7 }
  0x21   :  { %679 = vmatpush.bf16.msra.mxu2 %v1146_v36  ;;  %v1418_v15 = vld [vmem:[%s2419_s1 + $0x44] sm:$0xf]  ;;  %v1051_v16 = vld [vmem:[%s2419_s1 + $0x48] sm:$0xf0]  ;;  %v1126_v18 = vor.u32 %v1436_v11, %v1123_v12  ;;  %v1369_v19 = vld [vmem:[%s2419_s1 + $0x2c0] sm:$0xf]  ;;  %v1306_v21 = vor.u32 %v1483_v14, %v1305_v13 }
  0x22   :  { %692 = vmatpush.bf16.msra.mxu3 %v1210_v37  ;;  %v1499_v20 = vld [vmem:[%s2419_s1 + $0x2c4] sm:$0xf0]  ;;  %v1054_v22 = vor.u32 %v1418_v15, %v1051_v16  ;;  %v1434_v23 = vld [vmem:[%s2419_s1 + $0xc4] sm:$0xf]  ;;  %v1115_v24 = vld [vmem:[%s2419_s1 + $0xc8] sm:$0xf0] }
  0x23   :  { %666 = vmatpush.bf16.msra.mxu1 %v1082_v46  ;;  %654 = vmatmul.bf16.vlgmr.msra.gmra.mxu0 %v1847_v58  ;;  %v1297_v25 = vld [vmem:[%s2419_s1 + $0x230] sm:$0xf]  ;;  %v1481_v26 = vld [vmem:[%s2419_s1 + $0x234] sm:$0xf0]  ;;  %v1416_v27 = vld [vmem:[%s2419_s1 + $0x34] sm:$0xf]  ;;  %v1370_v29 = vor.u32 %v1499_v20, %v1369_v19  ;;  %v1118_v30 = vor.u32 %v1434_v23, %v1115_v24 }
  0x24   :  { %698 = vmatpush.bf16.msrb.mxu0 %v1330_v41  ;;  %680 = vmatmul.bf16.vlgmr.msra.gmra.mxu2 %v1833_v51  ;;  %v1043_v28 = vld [vmem:[%s2419_s1 + $0x38] sm:$0xf0]  ;;  %v1361_v31 = vld [vmem:[%s2419_s1 + $0x2b0] sm:$0xf]  ;;  %v1497_v32 = vld [vmem:[%s2419_s1 + $0x2b4] sm:$0xf0]  ;;  %v1298_v34 = vor.u32 %v1481_v26, %v1297_v25 }
  0x25   :  { %731 = vmatpush.bf16.msrb.mxu2 %v1402_v47  ;;  %693 = vmatmul.bf16.vlgmr.msra.gmra.mxu3 %v1867_v3  ;;  %v40_v33 = vld [vmem:[%s2418_s0 + $0x30] sm:$0xff]  ;;  %v1046_v35 = vor.u32 %v1416_v27, %v1043_v28  ;;  %v1107_v37 = vld [vmem:[%s2419_s1 + $0xb8] sm:$0xf0]  ;;  %v1289_v38 = vld [vmem:[%s2419_s1 + $0x220] sm:$0xf] }
  0x26   :  { %737 = vmatpush.bf16.msrb.mxu3 %v1078_v42  ;;  %667 = vmatmul.bf16.vlgmr.msra.gmra.mxu1 %v1869_v4  ;;  %v1432_v36 = vld [vmem:[%s2419_s1 + $0xb4] sm:$0xf]  ;;  %v1479_v39 = vld [vmem:[%s2419_s1 + $0x224] sm:$0xf0]  ;;  %v1414_v40 = vld [vmem:[%s2419_s1 + $0x24] sm:$0xf]  ;;  %v1362_v42 = vor.u32 %v1497_v32, %v1361_v31  ;;  %v1950_v43 = vpack.c.bf16 %v40_v33, %v40_v33 }
  0x27   :  { %711 = vmatpush.bf16.msrb.mxu1 %v1394_v52  ;;  %v1035_v41 = vld [vmem:[%s2419_s1 + $0x28] sm:$0xf0]  ;;  %v1110_v44 = vor.u32 %v1432_v36, %v1107_v37  ;;  %v1353_v45 = vld [vmem:[%s2419_s1 + $0x2a0] sm:$0xf]  ;;  %v1495_v46 = vld [vmem:[%s2419_s1 + $0x2a4] sm:$0xf0]  ;;  %v1290_v47 = vor.u32 %v1479_v39, %v1289_v38 }
  0x28   :  { %699 = vmatpush.bf16.msrb.mxu0 %v1322_v59  ;;  %v1038_v48 = vor.u32 %v1414_v40, %v1035_v41  ;;  %v1430_v49 = vld [vmem:[%s2419_s1 + $0xa4] sm:$0xf]  ;;  %v1099_v50 = vld [vmem:[%s2419_s1 + $0xa8] sm:$0xf0]  ;;  %v1281_v52 = vld [vmem:[%s2419_s1 + $0x210] sm:$0xf]  ;;  %v1354_v56 = vor.u32 %v1495_v46, %v1353_v45 }
  0x29   :  { %750 = vmatpush.bf16.msra.mxu2 %v1142_v55  ;;  %v1477_v53 = vld [vmem:[%s2419_s1 + $0x214] sm:$0xf0]  ;;  %v1412_v54 = vld [vmem:[%s2419_s1 + $0x14] sm:$0xf]  ;;  %v1027_v55 = vld [vmem:[%s2419_s1 + $0x18] sm:$0xf0]  ;;  %v1102_v57 = vor.u32 %v1430_v49, %v1099_v50 }
  0x2a   :  { %738 = vmatpush.bf16.msrb.mxu3 %v1070_v60  ;;  %v1345_v59 = vld [vmem:[%s2419_s1 + $0x290] sm:$0xf]  ;;  %v1493_v60 = vld [vmem:[%s2419_s1 + $0x294] sm:$0xf0]  ;;  %v1428_v61 = vld [vmem:[%s2419_s1 + $0x94] sm:$0xf]  ;;  %v1282_v62 = vor.u32 %v1477_v53, %v1281_v52  ;;  %v1030_v63 = vor.u32 %v1412_v54, %v1027_v55 }
  0x2b   :  { %712 = vmatpush.bf16.msrb.mxu1 %v1386_v5  ;;  %v1091_v0 = vld [vmem:[%s2419_s1 + $0x98] sm:$0xf0]  ;;  %v1273_v1 = vld [vmem:[%s2419_s1 + $0x200] sm:$0xf]  ;;  %v1475_v2 = vld [vmem:[%s2419_s1 + $0x204] sm:$0xf0]  ;;  %v1346_v8 = vor.u32 %v1493_v60, %v1345_v59 }
  0x2c   :  { %700 = vmatpush.bf16.msrb.mxu0 %v1314_v9  ;;  %v1410_v5 = vld [vmem:[%s2419_s1 + $0x4] sm:$0xf]  ;;  %v1456_v7 = vld [vmem:[%s2419_s1 + $0x174] sm:$0xf]  ;;  %v1203_v9 = vld [vmem:[%s2419_s1 + $0x178] sm:$0xf0]  ;;  %v1094_v12 = vor.u32 %v1428_v61, %v1091_v0  ;;  %v1274_v16 = vor.u32 %v1475_v2, %v1273_v1 }
  0x2d   :  { %751 = vmatpush.bf16.msra.mxu2 %v1134_v6  ;;  %v1019_v6 = vld [vmem:[%s2419_s1 + $0x8] sm:$0xf0]  ;;  %v1331_v11 = vld [vmem:[%s2419_s1 + $0x278] sm:$0xf0]  ;;  %v1337_v13 = vld [vmem:[%s2419_s1 + $0x280] sm:$0xf] }
  0x2e   :  { %739 = vmatpush.bf16.msrb.mxu3 %v1062_v10  ;;  %v1488_v10 = vld [vmem:[%s2419_s1 + $0x274] sm:$0xf]  ;;  %v1491_v14 = vld [vmem:[%s2419_s1 + $0x284] sm:$0xf0]  ;;  %v38_v15 = vld [vmem:[%s2418_s0 + $0x20] sm:$0xff] }
  0x2f   :  { %713 = vmatpush.bf16.msrb.mxu1 %v1378_v17  ;;  %v1022_v17 = vor.u32 %v1410_v5, %v1019_v6  ;;  %v1083_v19 = vld [vmem:[%s2419_s1 + $0x88] sm:$0xf0]  ;;  %v1472_v20 = vld [vmem:[%s2419_s1 + $0x1f4] sm:$0xf]  ;;  %v1267_v23 = vld [vmem:[%s2419_s1 + $0x1f8] sm:$0xf0]  ;;  %v1338_v26 = vor.u32 %v1491_v14, %v1337_v13 }
  0x30   :  { %701 = vmatpush.bf16.msrb.mxu0 %v1306_v21  ;;  %v1206_v21 = vor.u32 %v1456_v7, %v1203_v9  ;;  %v1504_v24 = vld [vmem:[%s2419_s1 + $0x2f4] sm:$0xf]  ;;  %v1395_v25 = vld [vmem:[%s2419_s1 + $0x2f8] sm:$0xf0]  ;;  %v39_v27 = vld [vmem:[%s2418_s0 + $0x28] sm:$0xff] }
  0x31   :  { %752 = vmatpush.bf16.msra.mxu2 %v1126_v18  ;;  %v1426_v18 = vld [vmem:[%s2419_s1 + $0x84] sm:$0xf]  ;;  %v1323_v33 = vld [vmem:[%s2419_s1 + $0x268] sm:$0xf0]  ;;  %v2061_v37 = vpack.c.bf16 %v39_v27, %v39_v27  ;;  %v1187_v45 = vld [vmem:[%s2419_s1 + $0x158] sm:$0xf0] }
  0x32   :  { %740 = vmatpush.bf16.msrb.mxu3 %v1054_v22  ;;  %v1334_v22 = vor.u32 %v1488_v10, %v1331_v11  ;;  %v1454_v28 = vld [vmem:[%s2419_s1 + $0x164] sm:$0xf]  ;;  %v1086_v31 = vor.u32 %v1426_v18, %v1083_v19  ;;  %v1259_v39 = vld [vmem:[%s2419_s1 + $0x1e8] sm:$0xf0]  ;;  %v1484_v46 = vld [vmem:[%s2419_s1 + $0x254] sm:$0xf] }
  0x33   :  { %714 = vmatpush.bf16.msrb.mxu1 %v1370_v29  ;;  %v1195_v29 = vld [vmem:[%s2419_s1 + $0x168] sm:$0xf0]  ;;  %v1486_v32 = vld [vmem:[%s2419_s1 + $0x264] sm:$0xf]  ;;  %v1468_v50 = vld [vmem:[%s2419_s1 + $0x1d4] sm:$0xf] }
  0x34   :  { %702 = vmatpush.bf16.msrb.mxu0 %v1298_v34  ;;  %1407 = vmatmul.msk.bf16.vlgmr.msrb.gmra.mxu2 %vm642_vm0, %v1950_v43  ;;  %v1270_v34 = vor.u32 %v1472_v20, %v1267_v23  ;;  %v1470_v36 = vld [vmem:[%s2419_s1 + $0x1e4] sm:$0xf]  ;;  %v1198_v38 = vor.u32 %v1454_v28, %v1195_v29  ;;  %v1387_v41 = vld [vmem:[%s2419_s1 + $0x2e8] sm:$0xf0]  ;;  %v1251_v52 = vld [vmem:[%s2419_s1 + $0x1d8] sm:$0xf0] }
  0x35   :  { %753 = vmatpush.bf16.msra.mxu2 %v1118_v30  ;;  %v2050_v30 = vpack.c.bf16 %v38_v15, %v38_v15  ;;  %v1502_v40 = vld [vmem:[%s2419_s1 + $0x2e4] sm:$0xf]  ;;  %v1500_v53 = vld [vmem:[%s2419_s1 + $0x2d4] sm:$0xf]  ;;  %v1379_v55 = vld [vmem:[%s2419_s1 + $0x2d8] sm:$0xf0] }
  0x36   :  { %741 = vmatpush.bf16.msrb.mxu3 %v1046_v35  ;;  %v1398_v35 = vor.u32 %v1504_v24, %v1395_v25  ;;  %v1390_v49 = vor.u32 %v1502_v40, %v1387_v41  ;;  %v1482_v60 = vld [vmem:[%s2419_s1 + $0x244] sm:$0xf]  ;;  %v1307_v61 = vld [vmem:[%s2419_s1 + $0x248] sm:$0xf0] }
  0x37   :  { %715 = vmatpush.bf16.msrb.mxu1 %v1362_v42  ;;  %v1326_v42 = vor.u32 %v1486_v32, %v1323_v33 }
  0x38   :  { %703 = vmatpush.bf16.msrb.mxu0 %v1290_v47  ;;  %v1315_v47 = vld [vmem:[%s2419_s1 + $0x258] sm:$0xf0] }
  0x39   :  { %754 = vmatpush.bf16.msra.mxu2 %v1110_v44  ;;  %v1452_v44 = vld [vmem:[%s2419_s1 + $0x154] sm:$0xf]  ;;  %v1318_v59 = vor.u32 %v1484_v46, %v1315_v47 }
  0x3a   :  { %742 = vmatpush.bf16.msrb.mxu3 %v1038_v48  ;;  %v1262_v48 = vor.u32 %v1470_v36, %v1259_v39  ;;  %v1190_v54 = vor.u32 %v1452_v44, %v1187_v45 }
  0x3b   :  { %716 = vmatpush.bf16.msrb.mxu1 %v1354_v56  ;;  %v1450_v56 = vld [vmem:[%s2419_s1 + $0x144] sm:$0xf] }
  0x3c   :  { %704 = vmatpush.bf16.msrb.mxu0 %v1282_v62 }
  0x3d   :  { %755 = vmatpush.bf16.msra.mxu2 %v1102_v57  ;;  %v1179_v57 = vld [vmem:[%s2419_s1 + $0x148] sm:$0xf0] }
  0x3e   :  { %743 = vmatpush.bf16.msrb.mxu3 %v1030_v63 }
  0x3f   :  { %717 = vmatpush.bf16.msrb.mxu1 %v1346_v8 }
  0x40   :  { %705 = vmatpush.bf16.msrb.mxu0 %v1274_v16 }
  0x41   :  { %756 = vmatpush.bf16.msra.mxu2 %v1094_v12 }
  0x42   :  { %744 = vmatpush.bf16.msrb.mxu3 %v1022_v17 }
  0x43   :  { %718 = vmatpush.bf16.msrb.mxu1 %v1338_v26  ;;  %706 = vmatmul.bf16.vlgmr.msrb.gmra.mxu0 %v2050_v30 }
  0x44   :  { %763 = vmatpush.bf16.msra.mxu0 %v1206_v21 }
  0x45   :  { %757 = vmatpush.bf16.msra.mxu2 %v1086_v31  ;;  %745 = vmatmul.bf16.vlgmr.msrb.gmra.mxu3 %v1847_v58 }
  0x46   :  { %789 = vmatpush.bf16.msra.mxu3 %v1334_v22  ;;  %719 = vmatmul.bf16.vlgmr.msrb.gmra.mxu1 %v2061_v37 }
  0x47   :  { %776 = vmatpush.bf16.msra.mxu1 %v1270_v34 }
  0x48   :  { %764 = vmatpush.bf16.msra.mxu0 %v1198_v38  ;;  %758 = vmatmul.bf16.vlgmr.msra.gmra.mxu2 %v1869_v4 }
  0x49   :  { %802 = vmatpush.bf16.msrb.mxu2 %v1398_v35 }
  0x4a   :  { %790 = vmatpush.bf16.msra.mxu3 %v1326_v42 }
  0x4b   :  { %14 = vsyncpa [#allocation3], 0  ;;  %777 = vmatpush.bf16.msra.mxu1 %v1262_v48  ;;  %v1254_v62 = vor.u32 %v1468_v50, %v1251_v52  ;;  %v1382_v63 = vor.u32 %v1500_v53, %v1379_v55  ;;  %v1466_v0 = vld [vmem:[%s2419_s1 + $0x1c4] sm:$0xf]  ;;  %v1182_v1 = vor.u32 %v1450_v56, %v1179_v57  ;;  %v1243_v2 = vld [vmem:[%s2419_s1 + $0x1c8] sm:$0xf0]  ;;  %v1310_v5 = vor.u32 %v1482_v60, %v1307_v61 }
  0x4c   :  { %765 = vmatpush.bf16.msra.mxu0 %v1190_v54  ;;  %v1498_v4 = vld [vmem:[%s2419_s1 + $0x2c4] sm:$0xf]  ;;  %v1371_v58 = vld [vmem:[%s2419_s1 + $0x2c8] sm:$0xf0]  ;;  %v1448_v6 = vld [vmem:[%s2419_s1 + $0x134] sm:$0xf]  ;;  %v1246_v10 = vor.u32 %v1466_v0, %v1243_v2 }
  0x4d   :  { %803 = vmatpush.bf16.msrb.mxu2 %v1390_v49  ;;  %v1171_v7 = vld [vmem:[%s2419_s1 + $0x138] sm:$0xf0]  ;;  %v1480_v8 = vld [vmem:[%s2419_s1 + $0x234] sm:$0xf]  ;;  %v1374_v11 = vor.u32 %v1498_v4, %v1371_v58  ;;  %v1446_v18 = vld [vmem:[%s2419_s1 + $0x124] sm:$0xf] }
  0x4e   :  { %791 = vmatpush.bf16.msra.mxu3 %v1318_v59  ;;  %v1299_v9 = vld [vmem:[%s2419_s1 + $0x238] sm:$0xf0]  ;;  %v1464_v12 = vld [vmem:[%s2419_s1 + $0x1b4] sm:$0xf]  ;;  %v1174_v13 = vor.u32 %v1448_v6, %v1171_v7  ;;  %v1163_v19 = vld [vmem:[%s2419_s1 + $0x128] sm:$0xf0] }
  0x4f   :  { %778 = vmatpush.bf16.msra.mxu1 %v1254_v62  ;;  %v1235_v14 = vld [vmem:[%s2419_s1 + $0x1b8] sm:$0xf0]  ;;  %v1496_v15 = vld [vmem:[%s2419_s1 + $0x2b4] sm:$0xf]  ;;  %v1302_v17 = vor.u32 %v1480_v8, %v1299_v9  ;;  %v1478_v20 = vld [vmem:[%s2419_s1 + $0x224] sm:$0xf]  ;;  %v1166_v25 = vor.u32 %v1446_v18, %v1163_v19 }
  0x50   :  { %766 = vmatpush.bf16.msra.mxu0 %v1182_v1  ;;  %v1363_v16 = vld [vmem:[%s2419_s1 + $0x2b8] sm:$0xf0]  ;;  %v1291_v21 = vld [vmem:[%s2419_s1 + $0x228] sm:$0xf0]  ;;  %v1238_v22 = vor.u32 %v1464_v12, %v1235_v14  ;;  %v1462_v24 = vld [vmem:[%s2419_s1 + $0x1a4] sm:$0xf] }
  0x51   :  { %804 = vmatpush.bf16.msrb.mxu2 %v1382_v63  ;;  %v1366_v23 = vor.u32 %v1496_v15, %v1363_v16  ;;  %v1227_v26 = vld [vmem:[%s2419_s1 + $0x1a8] sm:$0xf0]  ;;  %v1494_v27 = vld [vmem:[%s2419_s1 + $0x2a4] sm:$0xf]  ;;  %v1294_v29 = vor.u32 %v1478_v20, %v1291_v21  ;;  %v1444_v31 = vld [vmem:[%s2419_s1 + $0x114] sm:$0xf] }
  0x52   :  { %792 = vmatpush.bf16.msra.mxu3 %v1310_v5  ;;  %v1355_v28 = vld [vmem:[%s2419_s1 + $0x2a8] sm:$0xf0]  ;;  %v1155_v32 = vld [vmem:[%s2419_s1 + $0x118] sm:$0xf0]  ;;  %v1476_v33 = vld [vmem:[%s2419_s1 + $0x214] sm:$0xf]  ;;  %v1230_v35 = vor.u32 %v1462_v24, %v1227_v26 }
  0x53   :  { %779 = vmatpush.bf16.msra.mxu1 %v1246_v10  ;;  %v1283_v34 = vld [vmem:[%s2419_s1 + $0x218] sm:$0xf0]  ;;  %v1358_v36 = vor.u32 %v1494_v27, %v1355_v28  ;;  %v1460_v38 = vld [vmem:[%s2419_s1 + $0x194] sm:$0xf]  ;;  %v1158_v39 = vor.u32 %v1444_v31, %v1155_v32  ;;  %v1442_v45 = vld [vmem:[%s2419_s1 + $0x104] sm:$0xf] }
  0x54   :  { %767 = vmatpush.bf16.msra.mxu0 %v1174_v13  ;;  %v1219_v40 = vld [vmem:[%s2419_s1 + $0x198] sm:$0xf0]  ;;  %v1492_v41 = vld [vmem:[%s2419_s1 + $0x294] sm:$0xf]  ;;  %v1286_v44 = vor.u32 %v1476_v33, %v1283_v34  ;;  %v1147_v46 = vld [vmem:[%s2419_s1 + $0x108] sm:$0xf0] }
  0x55   :  { %805 = vmatpush.bf16.msrb.mxu2 %v1374_v11  ;;  %v1347_v42 = vld [vmem:[%s2419_s1 + $0x298] sm:$0xf0]  ;;  %v1474_v47 = vld [vmem:[%s2419_s1 + $0x204] sm:$0xf]  ;;  %v1275_v48 = vld [vmem:[%s2419_s1 + $0x208] sm:$0xf0]  ;;  %v1222_v52 = vor.u32 %v1460_v38, %v1219_v40  ;;  %v1150_v54 = vor.u32 %v1442_v45, %v1147_v46 }
  0x56   :  { %793 = vmatpush.bf16.msra.mxu3 %v1302_v17  ;;  %v1506_v49 = vld [vmem:[%s2419_s1 + $0x304] sm:$0xf]  ;;  %v1403_v50 = vld [vmem:[%s2419_s1 + $0x308] sm:$0xf0]  ;;  %v1350_v53 = vor.u32 %v1492_v41, %v1347_v42  ;;  %v1278_v57 = vor.u32 %v1474_v47, %v1275_v48  ;;  %v845_v0 = vld [vmem:[%s2421_s3 + $0x78] sm:$0xff]  ;;  %vm960_vm1 = vcmask 523264  }
  0x57   :  { %780 = vmatpush.bf16.msra.mxu1 %v1238_v22  ;;  %v1458_v55 = vld [vmem:[%s2419_s1 + $0x184] sm:$0xf]  ;;  %v1211_v56 = vld [vmem:[%s2419_s1 + $0x188] sm:$0xf0]  ;;  %v1406_v61 = vor.u32 %v1506_v49, %v1403_v50  ;;  %v844_v1 = vld [vmem:[%s2421_s3 + $0x70] sm:$0xff]  ;;  %vm984_vm2 = vcmask 80896  }
  0x58   :  { %768 = vmatpush.bf16.msra.mxu0 %v1166_v25  ;;  %v1490_v59 = vld [vmem:[%s2419_s1 + $0x284] sm:$0xf]  ;;  %v1339_v60 = vld [vmem:[%s2419_s1 + $0x288] sm:$0xf0]  ;;  %v1214_v62 = vor.u32 %v1458_v55, %v1211_v56  ;;  %v837_v4 = vld [vmem:[%s2421_s3 + $0x38] sm:$0xff]  ;;  %s1006_s29 = sshll.u32 %s2427_s9, 4  ;;  %s1007_s29 = int_to_ptr.hbm [resolvable:$true] %s1006_s29 }
  0x59   :  { %806 = vmatpush.bf16.msrb.mxu2 %v1366_v23  ;;  %v1342_v63 = vor.u32 %v1490_v59, %v1339_v60  ;;  %v838_v2 = vld [vmem:[%s2421_s3 + $0x40] sm:$0xff]  ;;  %v836_v58 = vld [vmem:[%s2421_s3 + $0x30] sm:$0xff]  ;;  %v835_v5 = vld [vmem:[%s2421_s3 + $0x28] sm:$0xff] }
  0x5a   :  { %794 = vmatpush.bf16.msra.mxu3 %v1294_v29  ;;  %v834_v6 = vld [vmem:[%s2421_s3 + $0x20] sm:$0xff]  ;;  %v833_v7 = vld [vmem:[%s2421_s3 + $0x18] sm:$0xff]  ;;  %v832_v9 = vld [vmem:[%s2421_s3 + $0x10] sm:$0xff] }
  0x5b   :  { %781 = vmatpush.bf16.msra.mxu1 %v1230_v35  ;;  %v831_v11 = vld [vmem:[%s2421_s3 + $0x8] sm:$0xff]  ;;  %v830_v12 = vld [vmem:[%s2421_s3] sm:$0xff]  ;;  %v861_v17 = vld [vmem:[%s2421_s3 + $0xf8] sm:$0xff] }
  0x5c   :  { %769 = vmatpush.bf16.msra.mxu0 %v1158_v39  ;;  %v146_v14 = vld [vmem:[%s2420_s2] sm:$0x3]  ;;  %v860_v18 = vld [vmem:[%s2421_s3 + $0xf0] sm:$0xff]  ;;  %v859_v21 = vld [vmem:[%s2421_s3 + $0xe8] sm:$0xff] }
  0x5d   :  { %807 = vmatpush.bf16.msrb.mxu2 %v1358_v36  ;;  %v148_v20 = vperm.slane %v146_v14, 0  ;;  %v858_v23 = vld [vmem:[%s2421_s3 + $0xe0] sm:$0xff]  ;;  %v857_v25 = vld [vmem:[%s2421_s3 + $0xd8] sm:$0xff]  ;;  %v856_v31 = vld [vmem:[%s2421_s3 + $0xd0] sm:$0xff]  ;;  %v149_v60 = vperm.slane %v146_v14, 1 }
  0x5e   :  { %795 = vmatpush.bf16.msra.mxu3 %v1286_v44  ;;  %v855_v33 = vld [vmem:[%s2421_s3 + $0xc8] sm:$0xff]  ;;  %v854_v38 = vld [vmem:[%s2421_s3 + $0xc0] sm:$0xff]  ;;  %v853_v41 = vld [vmem:[%s2421_s3 + $0xb8] sm:$0xff] }
  0x5f   :  { %782 = vmatpush.bf16.msra.mxu1 %v1222_v52  ;;  %v852_v44 = vld [vmem:[%s2421_s3 + $0xb0] sm:$0xff]  ;;  %v851_v46 = vld [vmem:[%s2421_s3 + $0xa8] sm:$0xff]  ;;  %v850_v48 = vld [vmem:[%s2421_s3 + $0xa0] sm:$0xff] }
  0x60   :  { %770 = vmatpush.bf16.msra.mxu0 %v1150_v54  ;;  %v848_v54 = vld [vmem:[%s2421_s3 + $0x90] sm:$0xff]  ;;  %v847_v55 = vld [vmem:[%s2421_s3 + $0x88] sm:$0xff]  ;;  %v846_v56 = vld [vmem:[%s2421_s3 + $0x80] sm:$0xff] }
  0x61   :  { %808 = vmatpush.bf16.msrb.mxu2 %v1350_v53  ;;  %v849_v53 = vld [vmem:[%s2421_s3 + $0x98] sm:$0xff] }
  0x62   :  { %796 = vmatpush.bf16.msra.mxu3 %v1278_v57  ;;  %v918_v14 = vld [vmem:[%s2423_s5 + $0x58] sm:$0xff] }
  0x63   :  { %783 = vmatpush.bf16.msra.mxu1 %v1214_v62  ;;  %771 = vmatmul.bf16.vlgmr.msra.gmra.mxu0 %v1833_v51  ;;  %v843_v51 = vld [vmem:[%s2421_s3 + $0x68] sm:$0xff] }
  0x64   :  { %822 = vmatpush.bf16.msrb.mxu0 %v1406_v61 }
  0x65   :  { %797 = vmatmul.bf16.vlgmr.msra.gmra.mxu3 %v2050_v30  ;;  %809 = vmatpush.bf16.msrb.mxu2 %v1342_v63  ;;  %v840_v30 = vld [vmem:[%s2421_s3 + $0x50] sm:$0xff] }
  0x66   :  { %784 = vmatmul.bf16.vlgmr.msra.gmra.mxu1 %v1867_v3  ;;  %v842_v3 = vld [vmem:[%s2421_s3 + $0x60] sm:$0xff]  ;;  %886 = vmatpush.msrb.mxu3 %v861_v17 }
  0x67   :  { %866 = vmatpush.msrb.mxu1 %v845_v0  ;;  %v915_v17 = vld [vmem:[%s2423_s5 + $0x40] sm:$0xff] }
  0x68   :  { %810 = vmatmul.bf16.vlgmr.msrb.gmra.mxu2 %v2061_v37  ;;  %v839_v37 = vld [vmem:[%s2421_s3 + $0x48] sm:$0xff]  ;;  %887 = vmatpush.msrb.mxu3 %v860_v18  ;;  %v914_v18 = vld [vmem:[%s2423_s5 + $0x38] sm:$0xff] }
  0x69   :  { %867 = vmatpush.msrb.mxu1 %v844_v1 }
  0x6a   :  { %888 = vmatpush.msrb.mxu3 %v859_v21  ;;  %v911_v21 = vld [vmem:[%s2423_s5 + $0x20] sm:$0xff] }
  0x6b   :  { %868 = vmatpush.msrb.mxu1 %v843_v51 }
  0x6c   :  { %889 = vmatpush.msrb.mxu3 %v858_v23  ;;  %v909_v23 = vld [vmem:[%s2423_s5 + $0x10] sm:$0xff] }
  0x6d   :  { %869 = vmatpush.msrb.mxu1 %v842_v3 }
  0x6e   :  { %890 = vmatpush.msrb.mxu3 %v857_v25  ;;  %v907_v25 = vld [vmem:[%s2423_s5] sm:$0xff] }
  0x70   :  { %891 = vmatpush.msrb.mxu3 %v856_v31  ;;  %v951_v31 = vld [vmem:[%s2425_s7 + $0x18] sm:$0xff] }
  0x72   :  { %892 = vmatpush.msrb.mxu3 %v855_v33  ;;  %v1509_v33 = vld [vmem:[%s2422_s4] ss:$0 sm:$0xff] }
  0x73   :  { %1408 = vmatmul.msk.bf16.vlgmr.msrb.gmra.mxu0 %vm642_vm0, %v1950_v43  ;;  %v841_v43 = vld [vmem:[%s2421_s3 + $0x58] sm:$0xff] }
  0x74   :  { %870 = vmatpush.msrb.mxu1 %v841_v43  ;;  %893 = vmatpush.msrb.mxu3 %v854_v38 }
  0x76   :  { %871 = vmatpush.msrb.mxu1 %v840_v30  ;;  %894 = vmatpush.msrb.mxu3 %v853_v41  ;;  %v948_v41 = vld [vmem:[%s2425_s7] sm:$0xff] }
  0x78   :  { %872 = vmatpush.msrb.mxu1 %v839_v37  ;;  %895 = vmatpush.msrb.mxu3 %v852_v44 }
  0x7a   :  { %873 = vmatpush.msrb.mxu1 %v838_v2  ;;  %896 = vmatpush.msrb.mxu3 %v851_v46 }
  0x7c   :  { %874 = vmatpush.msrb.mxu1 %v837_v4  ;;  %897 = vmatpush.msrb.mxu3 %v850_v48 }
  0x7e   :  { %875 = vmatpush.msrb.mxu1 %v836_v58  ;;  %898 = vmatpush.msrb.mxu3 %v849_v53 }
  0x80   :  { %876 = vmatpush.msrb.mxu1 %v835_v5  ;;  %899 = vmatpush.msrb.mxu3 %v848_v54 }
  0x82   :  { %877 = vmatpush.msrb.mxu1 %v834_v6  ;;  %900 = vmatpush.msrb.mxu3 %v847_v55 }
  0x84   :  { %878 = vmatpush.msrb.mxu1 %v833_v7  ;;  %901 = vmatpush.msrb.mxu3 %v846_v56 }
  0x86   :  { %879 = vmatpush.msrb.mxu1 %v832_v9 }
  0x88   :  { %880 = vmatpush.msrb.mxu1 %v831_v11  ;;  %v921_v11 = vld [vmem:[%s2423_s5 + $0x70] sm:$0xff] }
  0x8a   :  { %881 = vmatpush.msrb.mxu1 %v830_v12  ;;  %v920_v12 = vld [vmem:[%s2423_s5 + $0x68] sm:$0xff] }
  0xa0   :  { %v655_v8 = vpop.f32.mrf.mxu0 }
  0xa1   :  { %v656_v24 = vadd.f32 %v655_v8, %v148_v20  ;;  %v912_v20 = vld [vmem:[%s2423_s5 + $0x28] sm:$0xff] }
  0xa3   :  { %v668_v10 = vpop.f32.mrf.mxu1 }
  0xa4   :  { %v669_v27 = vadd.f32 %v668_v10, %v656_v24  ;;  %v922_v10 = vld [vmem:[%s2423_s5 + $0x78] sm:$0xff]  ;;  %v908_v24 = vld [vmem:[%s2423_s5 + $0x8] sm:$0xff] }
  0xa5   :  { %927 = vmatpush.msra.mxu0 %v922_v10 }
  0xa7   :  { %v681_v13 = vpop.f32.mrf.mxu2  ;;  %928 = vmatpush.msra.mxu0 %v921_v11 }
  0xa8   :  { %v694_v15 = vpop.f32.mrf.mxu3  ;;  %v657_v16 = vpop.f32.mrf.mxu0  ;;  %v682_v29 = vadd.f32 %v681_v13, %v669_v27  ;;  %v919_v13 = vld [vmem:[%s2423_s5 + $0x60] sm:$0xff]  ;;  %v954_v27 = vld [vmem:[%s2425_s7 + $0x30] sm:$0xff] }
  0xa9   :  { %929 = vmatpush.msra.mxu0 %v920_v12  ;;  %v916_v16 = vld [vmem:[%s2423_s5 + $0x48] sm:$0xff] }
  0xaa   :  { %v695_v32 = vadd.f32 %v694_v15, %v682_v29  ;;  %v917_v15 = vld [vmem:[%s2423_s5 + $0x50] sm:$0xff]  ;;  %v952_v29 = vld [vmem:[%s2425_s7 + $0x20] sm:$0xff] }
  0xab   :  { %v670_v19 = vpop.f32.mrf.mxu1  ;;  %930 = vmatpush.msra.mxu0 %v919_v13 }
  0xac   :  { %v913_v19 = vld [vmem:[%s2423_s5 + $0x30] sm:$0xff] }
  0xad   :  { %931 = vmatpush.msra.mxu0 %v918_v14 }
  0xaf   :  { %v683_v22 = vpop.f32.mrf.mxu2  ;;  %932 = vmatpush.msra.mxu0 %v917_v15 }
  0xb0   :  { %v696_v26 = vpop.f32.mrf.mxu3  ;;  %v910_v22 = vld [vmem:[%s2423_s5 + $0x18] sm:$0xff] }
  0xb1   :  { %933 = vmatpush.msra.mxu0 %v916_v16  ;;  %v955_v26 = vld [vmem:[%s2425_s7 + $0x38] sm:$0xff] }
  0xb2   :  { %972 = vmatpush.msra.mxu2 %v955_v26 }
  0xb3   :  { %934 = vmatpush.msra.mxu0 %v915_v17 }
  0xb4   :  { %973 = vmatpush.msra.mxu2 %v954_v27 }
  0xb5   :  { %935 = vmatpush.msra.mxu0 %v914_v18 }
  0xb7   :  { %v733_v28 = vpop.f32.mrf.mxu2  ;;  %936 = vmatpush.msra.mxu0 %v913_v19 }
  0xb9   :  { %937 = vmatpush.msra.mxu0 %v912_v20 }
  0xbb   :  { %938 = vmatpush.msra.mxu0 %v911_v21 }
  0xbd   :  { %939 = vmatpush.msra.mxu0 %v910_v22 }
  0xbf   :  { %v735_v36 = vpop.f32.mrf.mxu2  ;;  %940 = vmatpush.msra.mxu0 %v909_v23 }
  0xc0   :  { %v707_v34 = vpop.f32.mrf.mxu0 }
  0xc1   :  { %v708_v35 = vadd.f32 %v707_v34, %v695_v32  ;;  %941 = vmatpush.msra.mxu0 %v908_v24  ;;  %v950_v32 = vld [vmem:[%s2425_s7 + $0x10] sm:$0xff] }
  0xc3   :  { %v720_v39 = vpop.f32.mrf.mxu1  ;;  %942 = vmatpush.msra.mxu0 %v907_v25 }
  0xc4   :  { %v721_v40 = vadd.f32 %v720_v39, %v708_v35 }
  0xc6   :  { %v734_v42 = vadd.f32 %v733_v28, %v721_v40  ;;  %v953_v28 = vld [vmem:[%s2425_s7 + $0x28] sm:$0xff] }
  0xc7   :  { %974 = vmatpush.msra.mxu2 %v953_v28  ;;  %v949_v40 = vld [vmem:[%s2425_s7 + $0x8] sm:$0xff] }
  0xc8   :  { %v828_v45 = vmax.f32 %v734_v42, 0.0  ;;  %v709_v47 = vpop.f32.mrf.mxu0  ;;  %v746_v50 = vpop.f32.mrf.mxu3  ;;  %v1510_v42 = vld [vmem:[%s2424_s6] ss:$0 sm:$0xff]  ;;  %s1542_s6 = smov [#allocation2]  }
  0xc9   :  { %v747_v61 = vadd.f32 %v746_v50, %v149_v60  ;;  %975 = vmatpush.msra.mxu2 %v952_v29  ;;  %v1511_v47 = vld [vmem:[%s2426_s8] ss:$0 sm:$0xff]  ;;  %s1004_s7 = sshll.u32 %s1542_s6, 4  ;;  %s1005_s7 = int_to_ptr.vmem [resolvable:$true] %s1004_s7 }
  0xca   :  { %882 = vmatmul.f32.vlgmr.msrb.gmra.mxu1 %v828_v45 }
  0xcb   :  { %v759_v49 = vpop.f32.mrf.mxu2  ;;  %v722_v52 = vpop.f32.mrf.mxu1  ;;  %976 = vmatpush.msra.mxu2 %v951_v31 }
  0xcc   :  { %v760_v63 = vadd.f32 %v759_v49, %v747_v61 }
  0xcd   :  { %977 = vmatpush.msra.mxu2 %v950_v32 }
  0xcf   :  { %978 = vmatpush.msra.mxu2 %v949_v40 }
  0xd0   :  { %v748_v59 = vpop.f32.mrf.mxu3 }
  0xd1   :  { %979 = vmatpush.msra.mxu2 %v948_v41 }
  0xd3   :  { %v761_v57 = vpop.f32.mrf.mxu2 }
  0xe0   :  { %v772_v62 = vpop.f32.mrf.mxu0 }
  0xe1   :  { %v773_v1 = vadd.f32 %v772_v62, %v760_v63 }
  0xe3   :  { %v785_v0 = vpop.f32.mrf.mxu1 }
  0xe4   :  { %v786_v43 = vadd.f32 %v785_v0, %v773_v1 }
  0xe8   :  { %v798_v51 = vpop.f32.mrf.mxu3  ;;  %v774_v3 = vpop.f32.mrf.mxu0 }
  0xe9   :  { %v799_v37 = vadd.f32 %v798_v51, %v786_v43 }
  0xeb   :  { %v811_v30 = vpop.f32.mrf.mxu2  ;;  %v787_v2 = vpop.f32.mrf.mxu1 }
  0xec   :  { %v812_v4 = vadd.f32 %v811_v30, %v799_v37 }
  0xf0   :  { %v800_v58 = vpop.f32.mrf.mxu3  ;;  %v824_v5 = vpop.f32.mrf.mxu0 }
  0xf1   :  { %v825_v6 = vadd.f32 %v824_v5, %v812_v4 }
  0xf3   :  { %v813_v7 = vpop.f32.mrf.mxu2  ;;  %v829_v8 = vmax.f32 %v825_v6, 0.0 }
  0xf5   :  { %902 = vmatmul.f32.vlgmr.msrb.gmra.mxu3 %v829_v8 }
  0xf8   :  { %v826_v9 = vpop.f32.mrf.mxu0 }
 0x147   :  { %v883_v34 = vpop.f32.mrf.mxu1 }
 0x148   :  { %v884_v35 = vadd.f32 %v1509_v33, %v883_v34 }
 0x178   :  { %v903_v36 = vpop.f32.mrf.mxu3 }
 0x179   :  { %v904_v38 = vadd.f32 %v903_v36, %v884_v35 }
 0x17b   :  { %v906_v39 = vmax.f32 %v904_v38, 0.0 }
 0x17d   :  { %943 = vmatmul.f32.vlgmr.msra.gmra.mxu0 %v906_v39 }
 0x1fa   :  { %v944_v44 = vpop.f32.mrf.mxu0 }
 0x1fb   :  { %v945_v45 = vadd.f32 %v1510_v42, %v944_v44 }
 0x1fd   :  { %v947_v46 = vmax.f32 %v945_v45, 0.0 }
 0x1ff   :  { %1409 = vmatmul.msk.f32.vlgmr.msra.gmra.mxu2 %vm960_vm1, %v947_v46 }
 0x282   :  { %v981_v48 = vpop.f32.mrf.mxu2 }
 0x283   :  { %v982_v49 = vadd.f32 %v1511_v47, %v981_v48 }
 0x285   :  { %v985_v50 = vsel %vm984_vm2, %v982_v49, -inf }
 0x286   :  { %986 = vmax.xlane.f32.xlu0 %v985_v50 }
 0x2f9   :  { %v987_v52 = vpop.xlane.xlu0 %986 }
 0x2fa   :  { %v988_v53 = vsub.f32 %v982_v49, %v987_v52 }
 0x2fc   :  { %v989_v54 = vmul.f32 1.442695, %v988_v53 }
 0x2fe   :  { %1512 = vpow2.f32 %v989_v54 }
 0x304   :  { %v1513_v55 = vpop.eup %1512 }
 0x305   :  { %v991_v56 = vsel %vm984_vm2, %v1513_v55, 0.0 }
 0x306   :  { %992 = vadd.xlane.f32.xlu0 %v991_v56 }
 0x379   :  { %v993_v57 = vpop.xlane.xlu0 %992 }
 0x37a   :  { %1514 = vlog2.f32 %v993_v57 }
 0x380   :  { %v1515_v59 = vpop.eup %1514 }
 0x381   :  { %v995_v60 = vmul.f32 0.6931472, %v1515_v59 }
 0x383   :  { %v996_v61 = vadd.f32 %v995_v60, %v987_v52 }
 0x385   :  { %v997_v62 = vsub.f32 %v982_v49, %v996_v61 }
 0x387   :  { %998 = vst.msk [vmem:[#allocation2] sm:$0xff] %vm984_vm2, %v997_v62 }
 0x388   :  { %1009 = dma.vmem_to_hbm [thread:$0]  %s1005_s7, 128, %s1007_s29, [#allocation3]  }
 0x389   :  { %1540 = dma.done.wait [#allocation3], 128  }
 0x38a   :  { %1541 = vsyncadd [#allocation3], 4294967168 }
 0x38b   :  { %1014 = vsyncpa [#allocation3], 1 }

</bundles_post_ra>
